<compile_context>
chip_gen: v6e
topology: v6e:2x2x1
jax: 0.10.0
libtpu: 0.0.40
codegen_flags: <defaults>
</compile_context>

<pallas_src>
import numpy as np
import jax
import jax.numpy as jnp
from jax.experimental import pallas as pl
from jax.experimental.pallas import tpu as pltpu


def _senet_kernel(x_ref, e_ref, et_ref, w1_ref, w2_ref, o_ref):
    x = x_ref[...]                                                        # [TB, D]
    # Segment sum on the MXU (1/len is folded into W1 on the host).
    z = jnp.dot(x, e_ref[...], preferred_element_type=jnp.float32)       # [TB, F]
    # Excitation MLP in f32 (weights already f32 in VMEM; no per-step casts).
    h = jnp.maximum(jnp.dot(z, w1_ref[...], preferred_element_type=jnp.float32), 0.0)
    g = jax.nn.sigmoid(jnp.dot(h, w2_ref[...], preferred_element_type=jnp.float32))
    # repeat_interleave(g, length_per_key) == g @ E^T (standard-layout RHS, no transpose).
    gate = jnp.dot(g.astype(et_ref.dtype), et_ref[...],
                   preferred_element_type=jnp.float32)                   # [TB, D]
    # Output dtype is x.dtype anyway -> multiply in x.dtype, no [TB, D] f32 x copy.
    o_ref[...] = x * gate.astype(x.dtype)


def _round_up(v, m):
    return (v + m - 1) // m * m


def input_senet(x, length_per_key, w1, w2, *, tile_b=None):
    """x: [B, D]; w1: [F, R]; w2: [R, F]  (bias-free Linears, x @ W layout)."""
    B, D = x.shape
    F = len(length_per_key)
    R = w1.shape[1]
    assert sum(length_per_key) == D
    assert w1.shape == (F, R) and w2.shape == (R, F)

    xbytes = jnp.dtype(x.dtype).itemsize
    sublane = 16 if x.dtype == jnp.bfloat16 else 8
    Dp = _round_up(D, 128)          # VMEM lane footprint only (no data padding of x)
    Dsub = _round_up(D, sublane)
    Fsub = _round_up(F, sublane)

    # Host-side constants: membership E [D, F], its transpose, and 1/len folded into W1.
    seg_ids = np.repeat(np.arange(F), length_per_key)
    E = np.zeros((D, F), dtype=np.float32)
    E[np.arange(D), seg_ids] = 1.0
    inv_len = 1.0 / np.asarray(length_per_key, dtype=np.float32)
    E_j = jnp.asarray(E, dtype=x.dtype)                                   # [D, F]
    Et_j = jnp.asarray(E.T, dtype=x.dtype)                                # [F, D]
    w1_eff = jnp.asarray(inv_len[:, None]) * w1.astype(jnp.float32)      # diag(1/len) @ W1
    w2_f = w2.astype(jnp.float32)

    # --- VMEM accounting (with lane/sublane padding and double buffers) ------------
    res_e = 2 * Dsub * max(_round_up(F, 128), 128) * xbytes               # E  [D, F]
    res_et = 2 * Fsub * Dp * xbytes                                       # E^T [F, D]
    res_w = 2 * (_round_up(F, 8) + _round_up(R, 8)) * 128 * 4             # W1', W2 (f32)
    resident = res_e + res_et + res_w
    # Per batch-row: double-buffered x & out tiles + f32 gate temp + small f32 temps.
    per_row = 4 * Dp * xbytes + Dp * 4 + 6 * 128 * 4
    slack = 2 * 1024 * 1024

    try:
        info = pltpu.get_tpu_info()
        vmem_cap = int(getattr(info, "vmem_capacity_bytes", 128 * 1024 * 1024))
    except Exception:
        vmem_cap = 128 * 1024 * 1024
    # ~45% of per-core VMEM: ~57 MiB on 128 MiB parts (v5e/v6e), ~29 MiB on v7x.
    budget = int(min(max(vmem_cap * 0.45, 24 * 1024 * 1024), 64 * 1024 * 1024))

    tb = (budget - resident - slack) // max(per_row, 1)
    tb = max(sublane, int(tb))
    tb_cap = 2048 if vmem_cap >= 96 * 1024 * 1024 else 1024
    tb = min(tb, tb_cap, _round_up(B, sublane))
    if tile_b is not None:
        tb = tile_b
    tb = _round_up(int(tb), sublane)
    if tile_b is None and pl.cdiv(B, tb) < 2 and B > sublane:
        # v7x has 2 TensorCores: keep at least 2 batch-grid steps when B allows it.
        tb = _round_up(pl.cdiv(B, 2), sublane)
    # TODO(synk): for very large D on v7x (per-row f32 gate temp alone nearing VMEM),
    # add a D-tiled second grid axis instead of shrinking TILE_B further.

    grid = (pl.cdiv(B, tb),)
    vmem_need = resident + tb * per_row + slack
    vmem_limit = int(min(max(vmem_need, 32 * 1024 * 1024), int(vmem_cap * 0.75)))

    cost = pl.CostEstimate(
        flops=int(4.0 * B * D * F + 4.0 * B * F * R + B * D),
        transcendentals=int(B * F),
        bytes_accessed=int(2 * B * D * xbytes + 2 * D * F * xbytes + 2 * F * R * 4),
    )

    out = pl.pallas_call(
        _senet_kernel,
        out_shape=jax.ShapeDtypeStruct((B, D), x.dtype),
        grid=grid,
        in_specs=[
            pl.BlockSpec((tb, D), lambda i: (i, 0)),   # x tile (pipelined, full-D block)
            pl.BlockSpec((D, F), lambda i: (0, 0)),    # E        (VMEM-resident)
            pl.BlockSpec((F, D), lambda i: (0, 0)),    # E^T      (VMEM-resident)
            pl.BlockSpec((F, R), lambda i: (0, 0)),    # W1' = diag(1/len) @ W1, f32
            pl.BlockSpec((R, F), lambda i: (0, 0)),    # W2, f32
        ],
        out_specs=pl.BlockSpec((tb, D), lambda i: (i, 0)),
        compiler_params=pltpu.CompilerParams(
            dimension_semantics=("parallel",),          # batch shards across v7x's 2 TCs
            vmem_limit_bytes=vmem_limit,
        ),
        cost_estimate=cost,
    )(x, E_j, Et_j, w1_eff, w2_f)

    return out


def _reference(x, length_per_key, w1, w2):
    """Pure-JAX reference of the PyTorch forward."""
    splits = np.cumsum(length_per_key)[:-1]
    segs = jnp.split(x, splits, axis=1)
    xx = jnp.stack([s.mean(axis=1) for s in segs], axis=1)                # [B, F]
    xx = jax.nn.sigmoid(jnp.maximum(xx @ w1, 0.0) @ w2)                   # [B, F]
    gate = jnp.repeat(xx, np.asarray(length_per_key), axis=1)             # [B, D]
    return x * gate


if __name__ == "__main__":
    key = jax.random.PRNGKey(0)

    # Case 1: small shapes consistent with the module (B=2, 4 features, D=32).
    length_per_key = [4, 8, 16, 4]
    field_size = len(length_per_key)
    reduction_size = max(1, field_size // 2)
    B, D = 2, sum(length_per_key)
    kx, k1, k2, kx2, k3, k4 = jax.random.split(key, 6)
    x = jax.random.normal(kx, (B, D), dtype=jnp.float32)
    w1 = jax.random.normal(k1, (field_size, reduction_size), dtype=jnp.float32) * 0.5
    w2 = jax.random.normal(k2, (reduction_size, field_size), dtype=jnp.float32) * 0.5

    out = jax.block_until_ready(input_senet(x, length_per_key, w1, w2))
    ref = _reference(x, length_per_key, w1, w2)
    np.testing.assert_allclose(np.asarray(out), np.asarray(ref), rtol=1e-5, atol=1e-5)

    # Case 2: non-aligned B/D (9 rows, D=132) to exercise the partial edge block
    # and the non-128-multiple full-D block path.
    lpk2 = [7, 5, 3, 17, 100]
    F2 = len(lpk2)
    R2 = max(1, F2 // 2)
    B2, D2 = 9, sum(lpk2)
    x2 = jax.random.normal(kx2, (B2, D2), dtype=jnp.float32)
    w1b = jax.random.normal(k3, (F2, R2), dtype=jnp.float32) * 0.5
    w2b = jax.random.normal(k4, (R2, F2), dtype=jnp.float32) * 0.5

    out2 = jax.block_until_ready(input_senet(x2, lpk2, w1b, w2b))
    ref2 = _reference(x2, lpk2, w1b, w2b)
    np.testing.assert_allclose(np.asarray(out2), np.asarray(ref2), rtol=1e-5, atol=1e-5)

    print("KERNEL_OK")
</pallas_src>

<mosaic_0001>
module attributes {stable_mosaic.version = 11 : i64} {
  func.func @_senet_kernel(%arg0: i32, %arg1: memref<8x32xf32, #tpu.memory_space<vmem>>, %arg2: memref<32x4xf32, #tpu.memory_space<vmem>>, %arg3: memref<4x32xf32, #tpu.memory_space<vmem>>, %arg4: memref<4x2xf32, #tpu.memory_space<vmem>>, %arg5: memref<2x4xf32, #tpu.memory_space<vmem>>, %arg6: memref<8x32xf32, #tpu.memory_space<vmem>>) attributes {dimension_semantics = [#tpu.dimension_semantics<parallel>], iteration_bounds = array<i64: 1>, scalar_prefetch = 0 : i64, scratch_operands = 0 : i64, tpu.core_type = #tpu.core_type<tc>, window_params = [{transform_indices = @transform_0, window_bounds = array<i64: 8, 32>}, {pipeline_mode = #tpu.pipeline_mode<synchronous>, transform_indices = @transform_1, window_bounds = array<i64: 32, 4>}, {pipeline_mode = #tpu.pipeline_mode<synchronous>, transform_indices = @transform_2, window_bounds = array<i64: 4, 32>}, {pipeline_mode = #tpu.pipeline_mode<synchronous>, transform_indices = @transform_3, window_bounds = array<i64: 4, 2>}, {pipeline_mode = #tpu.pipeline_mode<synchronous>, transform_indices = @transform_4, window_bounds = array<i64: 2, 4>}, {transform_indices = @transform_5, window_bounds = array<i64: 8, 32>}]} {
    %c0 = arith.constant 0 : index
    %c0_0 = arith.constant 0 : index
    %0 = vector.load %arg1[%c0, %c0_0] : memref<8x32xf32, #tpu.memory_space<vmem>>, vector<8x32xf32>
    %c0_1 = arith.constant 0 : index
    %c0_2 = arith.constant 0 : index
    %1 = vector.load %arg2[%c0_1, %c0_2] : memref<32x4xf32, #tpu.memory_space<vmem>>, vector<32x4xf32>
    %cst = arith.constant dense<0.000000e+00> : vector<8x4xf32>
    %2 = tpu.matmul %0, %1, %cst {dimension_numbers = #tpu.dot_dimension_numbers<[1], [0], [0], [1], [0, 0, 1, 1], [], []>} : vector<8x32xf32>, vector<32x4xf32>, vector<8x4xf32> -> vector<8x4xf32>
    %c0_3 = arith.constant 0 : index
    %c0_4 = arith.constant 0 : index
    %3 = vector.load %arg4[%c0_3, %c0_4] : memref<4x2xf32, #tpu.memory_space<vmem>>, vector<4x2xf32>
    %cst_5 = arith.constant dense<0.000000e+00> : vector<8x2xf32>
    %4 = tpu.matmul %2, %3, %cst_5 {dimension_numbers = #tpu.dot_dimension_numbers<[1], [0], [0], [1], [0, 0, 1, 1], [], []>} : vector<8x4xf32>, vector<4x2xf32>, vector<8x2xf32> -> vector<8x2xf32>
    %cst_6 = arith.constant 0.000000e+00 : f32
    %5 = vector.broadcast %cst_6 : f32 to vector<8x2xf32>
    %6 = arith.maximumf %4, %5 : vector<8x2xf32>
    %c0_7 = arith.constant 0 : index
    %c0_8 = arith.constant 0 : index
    %7 = vector.load %arg5[%c0_7, %c0_8] : memref<2x4xf32, #tpu.memory_space<vmem>>, vector<2x4xf32>
    %cst_9 = arith.constant dense<0.000000e+00> : vector<8x4xf32>
    %8 = tpu.matmul %6, %7, %cst_9 {dimension_numbers = #tpu.dot_dimension_numbers<[1], [0], [0], [1], [0, 0, 1, 1], [], []>} : vector<8x2xf32>, vector<2x4xf32>, vector<8x4xf32> -> vector<8x4xf32>
    %9 = arith.negf %8 : vector<8x4xf32>
    %10 = math.exp %9 : vector<8x4xf32>
    %cst_10 = arith.constant 1.000000e+00 : f32
    %11 = vector.broadcast %cst_10 : f32 to vector<8x4xf32>
    %12 = arith.addf %11, %10 : vector<8x4xf32>
    %13 = arith.divf %11, %12 : vector<8x4xf32>
    %c0_11 = arith.constant 0 : index
    %c0_12 = arith.constant 0 : index
    %14 = vector.load %arg3[%c0_11, %c0_12] : memref<4x32xf32, #tpu.memory_space<vmem>>, vector<4x32xf32>
    %cst_13 = arith.constant dense<0.000000e+00> : vector<8x32xf32>
    %15 = tpu.matmul %13, %14, %cst_13 {dimension_numbers = #tpu.dot_dimension_numbers<[1], [0], [0], [1], [0, 0, 1, 1], [], []>} : vector<8x4xf32>, vector<4x32xf32>, vector<8x32xf32> -> vector<8x32xf32>
    %16 = arith.mulf %0, %15 : vector<8x32xf32>
    %c0_14 = arith.constant 0 : index
    %c0_15 = arith.constant 0 : index
    %17 = vector.load %arg6[%c0_14, %c0_15] : memref<8x32xf32, #tpu.memory_space<vmem>>, vector<8x32xf32>
    tpu.vector_store %arg6[%c0_14, %c0_15], %16 {strides = array<i32>} : memref<8x32xf32, #tpu.memory_space<vmem>>, vector<8x32xf32>,
    return
  }
  func.func @transform_0(%arg0: i32) -> (i32, i32) {
    %c0_i32 = arith.constant 0 : i32
    %c0_i32_0 = arith.constant 0 : i32
    return %arg0, %c0_i32 : i32, i32
  }
  func.func @transform_1(%arg0: i32) -> (i32, i32) {
    %c0_i32 = arith.constant 0 : i32
    %c0_i32_0 = arith.constant 0 : i32
    %c0_i32_1 = arith.constant 0 : i32
    return %c0_i32, %c0_i32_0 : i32, i32
  }
  func.func @transform_2(%arg0: i32) -> (i32, i32) {
    %c0_i32 = arith.constant 0 : i32
    %c0_i32_0 = arith.constant 0 : i32
    %c0_i32_1 = arith.constant 0 : i32
    return %c0_i32, %c0_i32_0 : i32, i32
  }
  func.func @transform_3(%arg0: i32) -> (i32, i32) {
    %c0_i32 = arith.constant 0 : i32
    %c0_i32_0 = arith.constant 0 : i32
    %c0_i32_1 = arith.constant 0 : i32
    return %c0_i32, %c0_i32_0 : i32, i32
  }
  func.func @transform_4(%arg0: i32) -> (i32, i32) {
    %c0_i32 = arith.constant 0 : i32
    %c0_i32_0 = arith.constant 0 : i32
    %c0_i32_1 = arith.constant 0 : i32
    return %c0_i32, %c0_i32_0 : i32, i32
  }
  func.func @transform_5(%arg0: i32) -> (i32, i32) {
    %c0_i32 = arith.constant 0 : i32
    %c0_i32_0 = arith.constant 0 : i32
    return %arg0, %c0_i32 : i32, i32
  }
}

</mosaic_0001>

<bundles_post_ra>
// kernel: tpu_custom_call.1
= control target key start
LH: loop header
LB: loop body
LE: loop exit
PB: predicated region body
PF: predicated region fallthrough
CT: control target
= control target key end

     0   :  { %10 = vsyncpa [#allocation3], 0  ;;  %v436_v1 = vmov 0.0   ;;  %vm437_vm0 = vmmov 0   ;;  %vm26_vm1 = vcmask 261120   ;;  %vm105_vm2 = vcmask 1043456   ;;  %s508_s0 = inlined_call_operand.vmem [shape: f32[2,32], index: 0, kind: input, shape index: {}]   ;;  %s509_s1 = inlined_call_operand.vmem [shape: f32[32,4], index: 1, kind: input, shape index: {}]   ;;  %s510_s2 = inlined_call_operand.vmem [shape: f32[4,32], index: 2, kind: input, shape index: {}]   ;;  %s511_s3 = inlined_call_operand.vmem [shape: f32[4,2], index: 3, kind: input, shape index: {}]   ;;  %s512_s4 = inlined_call_operand.vmem [shape: f32[2,4], index: 4, kind: input, shape index: {}]   ;;  %s513_s5 = inlined_call_operand.hbm [shape: f32[2,32], index: 5, kind: output, shape index: {}]  }
   0x1   :  { %v25_v0 = vld [vmem:[%s509_s1 + $0x18] sm:$0xff]  ;;  %379 = vmatprep.subr.mxu0 %v436_v1  ;;  %v24_v2 = vld [vmem:[%s509_s1 + $0x10] sm:$0xff]  ;;  %387 = vmatprep.mubr.msk.f32.mxu0 %vm437_vm0, %v436_v1  ;;  %v23_v3 = vld [vmem:[%s509_s1 + $0x8] sm:$0xff]  ;;  %vm101_vm3 = vcmask 31744   ;;  %vm185_vm4 = vcmask 1041408   ;;  %vm181_vm5 = vcmask 15360  }
   0x2   :  { %380 = vmatpush3.msra.mxu0 %v25_v0  ;;  %390 = vmatprep.subr.mxu1 %v436_v1  ;;  %v22_v4 = vld [vmem:[%s509_s1] sm:$0xff] }
   0x3   :  { %381 = vmatprep.subr.mxu0 %v436_v1  ;;  %392 = vmatprep.mubr.msk.f32.mxu1 %vm437_vm0, %v436_v1  ;;  %v21_v5 = vld [vmem:[%s508_s0] sm:$0xff] }
   0x4   :  { %382 = vmatpush3.msra.mxu0 %v24_v2  ;;  %v100_v6 = vld [vmem:[%s511_s3] sm:$0xf] }
   0x5   :  { %383 = vmatprep.subr.mxu0 %v436_v1  ;;  %391 = vmatpush3.msk.msra.mxu1 %vm105_vm2, %v100_v6  ;;  %v180_v7 = vld [vmem:[%s512_s4] sm:$0x3] }
   0x6   :  { %384 = vmatpush3.msra.mxu0 %v23_v3  ;;  %395 = vmatprep.subr.mxu1 %v436_v1  ;;  %v265_v13 = vld [vmem:[%s510_s2] sm:$0xf] }
   0x7   :  { %385 = vmatprep.subr.mxu0 %v436_v1 }
   0x8   :  { %386 = vmatpush3.msra.mxu0 %v22_v4 }
   0x9   :  { %388 = vmatmul.mubr.msk.f32.vlgmr.msra.gmra.mxu0 %vm26_vm1, %v21_v5 }
  0xc9   :  { %v96_v8 = vpop.f32.mrf.mxu0 }
  0xca   :  { %393 = vmatmul.mubr.msk.f32.vlgmr.msra.gmra.mxu1 %vm101_vm3, %v96_v8 }
  0xcb   :  { %v389_v9 = vpop.f32.mrf.mxu0  ;;  %396 = vmatpush3.msk.msra.mxu1 %vm185_vm4, %v180_v7  ;;  %397 = vmatprep.mubr.msk.f32.mxu1 %vm437_vm0, %v436_v1 }
  0xcc   :  { %400 = vmatprep.subr.mxu1 %v436_v1 }
 0x18a   :  { %v175_v10 = vpop.f32.mrf.mxu1 }
 0x18b   :  { %v179_v11 = vmax.f32 %v175_v10, 0.0 }
 0x18c   :  { %v394_v12 = vpop.f32.mrf.mxu1 }
 0x18d   :  { %398 = vmatmul.mubr.msk.f32.vlgmr.msra.gmra.mxu1 %vm181_vm5, %v179_v11 }
 0x18e   :  { %402 = vmatprep.mubr.msk.f32.mxu1 %vm437_vm0, %v436_v1  ;;  %401 = vmatpush3.msk.msra.mxu1 %vm105_vm2, %v265_v13 }
 0x24d   :  { %v255_v14 = vpop.f32.mrf.mxu1 }
 0x24e   :  { %v365_v15 = vmul.f32 -1.442695, %v255_v14 }
 0x24f   :  { %v399_v16 = vpop.f32.mrf.mxu1 }
 0x250   :  { %410 = vpow2.f32 %v365_v15 }
 0x25d   :  { %v411_v17 = vpop.eup %410 }
 0x25e   :  { %v262_v18 = vadd.f32 1.0, %v411_v17 }
 0x260   :  { %412 = vrcp.f32 %v262_v18 }
 0x26d   :  { %v413_v19 = vpop.eup %412 }
 0x26e   :  { %403 = vmatmul.mubr.msk.f32.vlgmr.msra.gmra.mxu1 %vm101_vm3, %v413_v19 }
 0x32e   :  { %v338_v20 = vpop.f32.mrf.mxu1 }
 0x32f   :  { %v342_v21 = vmul.f32 %v338_v20, %v21_v5 }
 0x330   :  { %v404_v22 = vpop.f32.mrf.mxu1 }
 0x331   :  { %343 = vst.msk [vmem:[#allocation2] sm:$0xff] %vm26_vm1, %v342_v21 }
 0x332   :  { %348 = vsyncadd [#allocation3], 96  ;;  %s438_s4 = smov [#allocation2]  }
 0x333   :  { %s349_s2 = sshll.u32 %s438_s4, 4  ;;  %s350_s2 = int_to_ptr.vmem [resolvable:$true] %s349_s2 }
 0x334   :  { %s414_s6 = scalar_lea.vmem %s350_s2, 32  ;;  %s418_s7 = scalar_lea.vmem %s350_s2, 128 }
 0x335   :  { %p415_p0 = scmp.ne.s32.totalorder %s350_s2, %s414_s6  ;;  %p419_p1 = scmp.lt.s32.totalorder %s350_s2, %s350_s2 }
 0x336   :  { %p420_p2 = scmp.lt.s32.totalorder %s418_s7, %s414_s6 }
 0x338   :  { %p421_p3 = por %p420_p2, %p419_p1 }
 0x33a   :  { %p422_p4 = pnand %p421_p3, %p415_p0 }
 0x33c   :  { %425 = shalt.err (!%p422_p4)
}
 0x33d   :  { %s439_s8 = smov 32   ;;  %s440_s9 = smov 2  }
 0x33e   :  { %355 = dma.vmem_to_hbm [thread:$0]  %s350_s2, 32, %s513_s5, [#allocation3], %s439_s8, %s439_s8, %s440_s9  }
 0x33f   :  { %434 = dma.done.wait [#allocation3], 128  }
 0x340   :  { %435 = vsyncadd [#allocation3], 4294967168 }
 0x341   :  { %359 = vsyncpa [#allocation3], 1 }

</bundles_post_ra>
